<compile_context>
chip_gen: v7x
topology: tpu7x:2x2x1
jax: 0.10.0
libtpu: 0.0.40
codegen_flags: <defaults>
</compile_context>

<pallas_src>
import functools
import math

import jax
import jax.numpy as jnp
from jax.experimental import pallas as pl
from jax.experimental.pallas import tpu as pltpu


def _round_up(n: int, m: int) -> int:
    return ((n + m - 1) // m) * m


def _rope_kernel(pos_ref, sel_ref, swap_ref, x_ref, o_ref, *, fold: int):
    """Fused RoPE on a (row_tile, C) tile, C = fold * d_k (lane-dense)."""
    pos = pos_ref[...]                       # (R, fold) f32 token positions
    sel = sel_ref[...]                       # (fold, C)  f32 group-masked inv-freqs
    # angle[r, l] = pos[r, l // d_k] * inv_freq_dup[l % d_k]
    ang = pos[:, 0:1] * sel[0:1, :]
    for g in range(1, fold):                 # fold <= 8, unrolled at trace time
        ang = ang + pos[:, g:g + 1] * sel[g:g + 1, :]
    c = jnp.cos(ang)                         # EUP slot (idle in this kernel)
    s = jnp.sin(ang)
    x = x_ref[...].astype(jnp.float32)       # rotation math always in f32
    # pair swap + negate via signed-permutation matmul on the (idle) MXU:
    #   x_rot[:, 2i] = -x[:, 2i+1], x_rot[:, 2i+1] = x[:, 2i]
    x_rot = jnp.dot(x, swap_ref[...], preferred_element_type=jnp.float32)
    o_ref[...] = (x * c + x_rot * s).astype(o_ref.dtype)


class RotaryPositionalEmbedding:
    """JAX/Pallas port of the PyTorch RotaryPositionalEmbedding module."""

    _MAX_FOLD = 8                      # bound on unrolled angle-sum VPU work
    _TARGET_TILE_BYTES = 1 << 20       # ~1 MiB of x per grid step
    _MAX_ROW_TILE = 2048

    def __init__(self, theta, d_k, max_seq_len, dtype=jnp.float32):
        assert d_k % 2 == 0
        self.theta = float(theta)
        self.d_k = d_k
        self.max_seq_len = max_seq_len
        self.dtype = dtype
        # Tables / coefficients are always built in f32 (precision, per review).
        half = jnp.arange(d_k // 2, dtype=jnp.float32)
        inv_freq = 1.0 / (self.theta ** (2.0 * half / d_k))       # (d_k//2,)
        pos = jnp.arange(max_seq_len, dtype=jnp.float32)
        rotation_mat = pos[:, None] * inv_freq[None, :]
        self.rot_cos = jnp.cos(rotation_mat)                      # (max_seq_len, d_k//2)
        self.rot_sin = jnp.sin(rotation_mat)
        self.inv_freq = inv_freq
        # inv_freq duplicated onto even/odd lanes: dup[2i] = dup[2i+1] = inv_freq[i]
        self._freq_dup = jnp.repeat(inv_freq, 2)                  # (d_k,)
        self._const_cache = {}

    def _constants(self, fold: int):
        """Tiny VMEM-resident constants (sel, swap) for a given lane-fold factor."""
        if fold in self._const_cache:
            return self._const_cache[fold]
        d_k = self.d_k
        c = fold * d_k
        lane = jnp.arange(c)
        freq_row = self._freq_dup[lane % d_k]                     # (c,)
        group = (lane // d_k)[None, :] == jnp.arange(fold)[:, None]
        sel = group.astype(jnp.float32) * freq_row[None, :]       # (fold, c)
        half = jnp.arange(c // 2)
        swap = jnp.zeros((c, c), jnp.float32)
        swap = swap.at[2 * half + 1, 2 * half].set(-1.0)
        swap = swap.at[2 * half, 2 * half + 1].set(1.0)
        self._const_cache[fold] = (sel, swap)
        return sel, swap

    def __call__(self, x, token_positions=None):
        d_k = self.d_k
        assert x.shape[-1] == d_k
        seq_len = x.shape[-2]
        lead_shape = x.shape[:-1]
        n_rows = math.prod(lead_shape)

        if token_positions is None:
            token_positions = jnp.arange(seq_len, dtype=jnp.int32)
        # Same broadcasting contract as the PyTorch module; positions are tiny
        # (4 bytes/token) compared with x, so this never adds a full HBM pass.
        pos = jnp.broadcast_to(token_positions, lead_shape).astype(jnp.float32)

        # Lane-fold: pack `fold` consecutive tokens into the lane axis so the
        # kernel's last dim is 128 (full-lane, unmasked stores).
        fold = 1
        if d_k < 128 and 128 % d_k == 0:
            f = min(128 // d_k, self._MAX_FOLD)
            if n_rows % f == 0:
                fold = f
        c_lanes = fold * d_k
        rows = n_rows // fold

        x2 = x.reshape(rows, c_lanes)          # free row-major reshape
        pos2 = pos.reshape(rows, fold)
        sel, swap = self._constants(fold)

        # Row tiling: biggest tile that comfortably fits VMEM; grid steps pipeline.
        bytes_per_row = c_lanes * x2.dtype.itemsize
        row_tile = self._TARGET_TILE_BYTES // max(1, bytes_per_row)
        row_tile = max(8, min(self._MAX_ROW_TILE, row_tile))
        row_tile -= row_tile % 8
        row_tile = min(row_tile, _round_up(rows, 8))
        grid = (pl.cdiv(rows, row_tile),)

        out = pl.pallas_call(
            functools.partial(_rope_kernel, fold=fold),
            out_shape=jax.ShapeDtypeStruct((rows, c_lanes), x.dtype),
            grid=grid,
            in_specs=[
                pl.BlockSpec((row_tile, fold), lambda i: (i, 0)),
                pl.BlockSpec((fold, c_lanes), lambda i: (0, 0)),      # resident
                pl.BlockSpec((c_lanes, c_lanes), lambda i: (0, 0)),   # resident
                pl.BlockSpec((row_tile, c_lanes), lambda i: (i, 0)),
            ],
            out_specs=pl.BlockSpec((row_tile, c_lanes), lambda i: (i, 0)),
            compiler_params=pltpu.CompilerParams(
                dimension_semantics=("parallel",),      # shards rows across v7x TCs
                vmem_limit_bytes=32 * 1024 * 1024,      # safe on v5e/v6e/v7x
            ),
        )(pos2, sel, swap, x2)

        return out.reshape(x.shape)


def _rope_reference(rot_cos, rot_sin, x, token_positions):
    """Pure-JAX reference mirroring the PyTorch forward."""
    cos = rot_cos[token_positions]
    sin = rot_sin[token_positions]
    xe = x[..., 0::2].astype(jnp.float32)
    xo = x[..., 1::2].astype(jnp.float32)
    first = xe * cos - xo * sin
    second = xe * sin + xo * cos
    return jnp.stack((first, second), axis=-1).reshape(x.shape).astype(x.dtype)


if __name__ == "__main__":
    theta = 10000.0
    d_k = 32
    max_seq_len = 32
    batch, seq = 2, 16

    key = jax.random.PRNGKey(0)
    kx, kp = jax.random.split(key)
    x = jax.random.normal(kx, (batch, seq, d_k), dtype=jnp.float32)
    token_positions = jax.random.randint(kp, (batch, seq), 0, max_seq_len,
                                         dtype=jnp.int32)

    rope = RotaryPositionalEmbedding(theta, d_k, max_seq_len)
    rope_fn = jax.jit(lambda xx, tp: rope(xx, tp))
    out = jax.block_until_ready(rope_fn(x, token_positions))

    ref = _rope_reference(rope.rot_cos, rope.rot_sin, x, token_positions)
    assert out.shape == x.shape and out.dtype == x.dtype
    assert jnp.allclose(out, ref, atol=1e-4, rtol=1e-4), (
        "max abs err = %g" % float(jnp.max(jnp.abs(out - ref))))

    print("KERNEL_OK")
</pallas_src>

<mosaic_0001>
module attributes {stable_mosaic.version = 11 : i64} {
  func.func @_rope_kernel(%arg0: i32, %arg1: memref<8x4xf32, #tpu.memory_space<vmem>>, %arg2: memref<4x128xf32, #tpu.memory_space<vmem>>, %arg3: memref<128x128xf32, #tpu.memory_space<vmem>>, %arg4: memref<8x128xf32, #tpu.memory_space<vmem>>, %arg5: memref<8x128xf32, #tpu.memory_space<vmem>>) attributes {dimension_semantics = [#tpu.dimension_semantics<parallel>], iteration_bounds = array<i64: 1>, scalar_prefetch = 0 : i64, scratch_operands = 0 : i64, tpu.core_type = #tpu.core_type<tc>, window_params = [{transform_indices = @transform_0, window_bounds = array<i64: 8, 4>}, {pipeline_mode = #tpu.pipeline_mode<synchronous>, transform_indices = @transform_1, window_bounds = array<i64: 4, 128>}, {pipeline_mode = #tpu.pipeline_mode<synchronous>, transform_indices = @transform_2, window_bounds = array<i64: 128, 128>}, {transform_indices = @transform_3, window_bounds = array<i64: 8, 128>}, {transform_indices = @transform_4, window_bounds = array<i64: 8, 128>}]} {
    %c0 = arith.constant 0 : index
    %c0_0 = arith.constant 0 : index
    %0 = vector.load %arg1[%c0, %c0_0] : memref<8x4xf32, #tpu.memory_space<vmem>>, vector<8x4xf32>
    %c0_1 = arith.constant 0 : index
    %c0_2 = arith.constant 0 : index
    %1 = vector.load %arg2[%c0_1, %c0_2] : memref<4x128xf32, #tpu.memory_space<vmem>>, vector<4x128xf32>
    %2 = vector.extract_strided_slice %0 {offsets = [0, 0], sizes = [8, 1], strides = [1, 1]} : vector<8x4xf32> to vector<8x1xf32>
    %3 = vector.extract_strided_slice %1 {offsets = [0, 0], sizes = [1, 128], strides = [1, 1]} : vector<4x128xf32> to vector<1x128xf32>
    %4 = vector.broadcast %2 : vector<8x1xf32> to vector<8x128xf32>
    %5 = vector.broadcast %3 : vector<1x128xf32> to vector<8x128xf32>
    %6 = arith.mulf %4, %5 : vector<8x128xf32>
    %7 = vector.extract_strided_slice %0 {offsets = [0, 1], sizes = [8, 1], strides = [1, 1]} : vector<8x4xf32> to vector<8x1xf32>
    %8 = vector.extract_strided_slice %1 {offsets = [1, 0], sizes = [1, 128], strides = [1, 1]} : vector<4x128xf32> to vector<1x128xf32>
    %9 = vector.broadcast %7 : vector<8x1xf32> to vector<8x128xf32>
    %10 = vector.broadcast %8 : vector<1x128xf32> to vector<8x128xf32>
    %11 = arith.mulf %9, %10 : vector<8x128xf32>
    %12 = arith.addf %6, %11 : vector<8x128xf32>
    %13 = vector.extract_strided_slice %0 {offsets = [0, 2], sizes = [8, 1], strides = [1, 1]} : vector<8x4xf32> to vector<8x1xf32>
    %14 = vector.extract_strided_slice %1 {offsets = [2, 0], sizes = [1, 128], strides = [1, 1]} : vector<4x128xf32> to vector<1x128xf32>
    %15 = vector.broadcast %13 : vector<8x1xf32> to vector<8x128xf32>
    %16 = vector.broadcast %14 : vector<1x128xf32> to vector<8x128xf32>
    %17 = arith.mulf %15, %16 : vector<8x128xf32>
    %18 = arith.addf %12, %17 : vector<8x128xf32>
    %19 = vector.extract_strided_slice %0 {offsets = [0, 3], sizes = [8, 1], strides = [1, 1]} : vector<8x4xf32> to vector<8x1xf32>
    %20 = vector.extract_strided_slice %1 {offsets = [3, 0], sizes = [1, 128], strides = [1, 1]} : vector<4x128xf32> to vector<1x128xf32>
    %21 = vector.broadcast %19 : vector<8x1xf32> to vector<8x128xf32>
    %22 = vector.broadcast %20 : vector<1x128xf32> to vector<8x128xf32>
    %23 = arith.mulf %21, %22 : vector<8x128xf32>
    %24 = arith.addf %18, %23 : vector<8x128xf32>
    %25 = math.cos %24 : vector<8x128xf32>
    %26 = math.sin %24 : vector<8x128xf32>
    %c0_3 = arith.constant 0 : index
    %c0_4 = arith.constant 0 : index
    %27 = vector.load %arg4[%c0_3, %c0_4] : memref<8x128xf32, #tpu.memory_space<vmem>>, vector<8x128xf32>
    %c0_5 = arith.constant 0 : index
    %c0_6 = arith.constant 0 : index
    %28 = vector.load %arg3[%c0_5, %c0_6] : memref<128x128xf32, #tpu.memory_space<vmem>>, vector<128x128xf32>
    %cst = arith.constant dense<0.000000e+00> : vector<8x128xf32>
    %29 = tpu.matmul %27, %28, %cst {dimension_numbers = #tpu.dot_dimension_numbers<[1], [0], [0], [1], [0, 0, 1, 1], [], []>} : vector<8x128xf32>, vector<128x128xf32>, vector<8x128xf32> -> vector<8x128xf32>
    %30 = arith.mulf %27, %25 : vector<8x128xf32>
    %31 = arith.mulf %29, %26 : vector<8x128xf32>
    %32 = arith.addf %30, %31 : vector<8x128xf32>
    %c0_7 = arith.constant 0 : index
    %c0_8 = arith.constant 0 : index
    %33 = vector.load %arg5[%c0_7, %c0_8] : memref<8x128xf32, #tpu.memory_space<vmem>>, vector<8x128xf32>
    tpu.vector_store %arg5[%c0_7, %c0_8], %32 {strides = array<i32>} : memref<8x128xf32, #tpu.memory_space<vmem>>, vector<8x128xf32>,
    return
  }
  func.func @transform_0(%arg0: i32) -> (i32, i32) {
    %c0_i32 = arith.constant 0 : i32
    %c0_i32_0 = arith.constant 0 : i32
    return %arg0, %c0_i32 : i32, i32
  }
  func.func @transform_1(%arg0: i32) -> (i32, i32) {
    %c0_i32 = arith.constant 0 : i32
    %c0_i32_0 = arith.constant 0 : i32
    %c0_i32_1 = arith.constant 0 : i32
    return %c0_i32, %c0_i32_0 : i32, i32
  }
  func.func @transform_2(%arg0: i32) -> (i32, i32) {
    %c0_i32 = arith.constant 0 : i32
    %c0_i32_0 = arith.constant 0 : i32
    %c0_i32_1 = arith.constant 0 : i32
    return %c0_i32, %c0_i32_0 : i32, i32
  }
  func.func @transform_3(%arg0: i32) -> (i32, i32) {
    %c0_i32 = arith.constant 0 : i32
    %c0_i32_0 = arith.constant 0 : i32
    return %arg0, %c0_i32 : i32, i32
  }
  func.func @transform_4(%arg0: i32) -> (i32, i32) {
    %c0_i32 = arith.constant 0 : i32
    %c0_i32_0 = arith.constant 0 : i32
    return %arg0, %c0_i32 : i32, i32
  }
}

</mosaic_0001>

<bundles_post_ra>
// kernel: _lambda_.1
= control target key start
LH: loop header
LB: loop body
LE: loop exit
PB: predicated region body
PF: predicated region fallthrough
CT: control target
= control target key end

     0   :  { %v471_v0 = vmov 0   ;;  %v472_v2 = vmov 0.0|0.0   ;;  %v473_v6 = vmov 2   ;;  %vm474_vm0 = vmmov 0   ;;  %s594_s0 = inlined_call_operand.vmem [shape: f32[8,4], index: 0, kind: input, shape index: {}]   ;;  %s595_s2 = inlined_call_operand.vmem [shape: f32[128,128], index: 2, kind: input, shape index: {}]   ;;  %s596_s3 = inlined_call_operand.vmem [shape: f32[8,128], index: 3, kind: input, shape index: {}]   ;;  %s597_s1 = inlined_call_operand.vmem [shape: f32[4,128], index: 1, kind: input, shape index: {}]   ;;  %s598_s4 = inlined_call_operand.vmem [shape: f32[8,128], index: 4, kind: output, shape index: {}]  }
   0x1   :  { %462 = vset.pattern.permute.xlu0 %v471_v0  ;;  %v17_v1 = vld [vmem:[%s594_s0] sm:$0xff]  ;;  %421 = vmatprep.subr.bf16.mxu0 %v472_v2  ;;  %v268_v4 = vld [vmem:[%s595_s2 + $0x8] sm:$0xff]  ;;  %v269_v7 = vld [vmem:[%s595_s2 + $0x10] sm:$0xff]  ;;  %v475_v9 = vmov 0.0   ;;  %v476_v13 = vmov 1   ;;  %v477_v14 = vmov 3   ;;  %v24_v32 = vlaneseq }
   0x2   :  { %v267_v3 = vld [vmem:[%s595_s2] sm:$0xff]  ;;  %21 = vperm.xlu0 %462, %v17_v1   ;;  %464 = vset.pattern.permute.xlu1 %v473_v6  ;;  %v270_v8 = vld [vmem:[%s595_s2 + $0x18] sm:$0xff]  ;;  %v272_v12 = vld [vmem:[%s595_s2 + $0x28] sm:$0xff]  ;;  %v478_v0 = vmov 2102212464  }
   0x3   :  { %v422_v5 = vpack.c.bf16 %v268_v4, %v267_v3  ;;  %40 = vperm.xlu1 %464, %v17_v1   ;;  %418 = vmatprep.mubr.msk.f32.mxu0 %vm474_vm0, %v475_v9  ;;  %v425_v10 = vpack.c.bf16 %v270_v8, %v269_v7  ;;  %v271_v11 = vld [vmem:[%s595_s2 + $0x20] sm:$0xff]  ;;  %v273_v16 = vld [vmem:[%s595_s2 + $0x30] sm:$0xff]  ;;  %v274_v17 = vld [vmem:[%s595_s2 + $0x38] sm:$0xff]  ;;  %v25_v33 = vshrl.u32 %v24_v32, 7  ;;  %v481_v7 = vmov 2475754826  }
   0x4   :  { %v428_v15 = vpack.c.bf16 %v272_v12, %v271_v11  ;;  %v431_v18 = vpack.c.bf16 %v274_v17, %v273_v16  ;;  %v275_v19 = vld [vmem:[%s595_s2 + $0x40] sm:$0xff]  ;;  %v276_v20 = vld [vmem:[%s595_s2 + $0x48] sm:$0xff]  ;;  %v277_v22 = vld [vmem:[%s595_s2 + $0x50] sm:$0xff]  ;;  %v482_v9 = vmov 2131351028  }
   0x5   :  { %423 = vmatpush3.bf16.msra.mxu0 %v422_v5  ;;  %v434_v21 = vpack.c.bf16 %v276_v20, %v275_v19  ;;  %v278_v23 = vld [vmem:[%s595_s2 + $0x58] sm:$0xff]  ;;  %v279_v25 = vld [vmem:[%s595_s2 + $0x60] sm:$0xff]  ;;  %v280_v26 = vld [vmem:[%s595_s2 + $0x68] sm:$0xff]  ;;  %v26_v34 = vsub.s32 0, %v25_v33  ;;  %v45_v36 = vsub.s32 2, %v25_v33  ;;  %v35_v37 = vsub.s32 1, %v25_v33 }
   0x6   :  { %424 = vmatprep.subr.bf16.mxu0 %v472_v2  ;;  %463 = vset.pattern.permute.xlu0 %v476_v13  ;;  %v437_v24 = vpack.c.bf16 %v278_v23, %v277_v22  ;;  %v440_v27 = vpack.c.bf16 %v280_v26, %v279_v25  ;;  %v281_v28 = vld [vmem:[%s595_s2 + $0x70] sm:$0xff]  ;;  %v282_v29 = vld [vmem:[%s595_s2 + $0x78] sm:$0xff]  ;;  %v563_v31 = vld [vmem:[%s596_s3] sm:$0xff]  ;;  %v55_v40 = vsub.s32 3, %v25_v33  ;;  %v480_v5 = vmov 683565275  }
   0x7   :  { %30 = vperm.xlu0 %463, %v17_v1   ;;  %465 = vset.pattern.permute.xlu1 %v477_v14  ;;  %v443_v30 = vpack.c.bf16 %v282_v29, %v281_v28  ;;  %v18_v35 = vld [vmem:[%s597_s1] sm:$0xf]  ;;  %v483_v12 = vmov 1326507024  }
   0x8   :  { %50 = vperm.xlu1 %465, %v17_v1   ;;  %v27_v38 = vrot.slane %v18_v35, %v26_v34  ;;  %v46_v42 = vrot.slane %v18_v35, %v45_v36  ;;  %v36_v43 = vrot.slane %v18_v35, %v35_v37  ;;  %v56_v45 = vrot.slane %v18_v35, %v55_v40 }
   0x9   :  { %426 = vmatpush3.bf16.msra.mxu0 %v425_v10 }
   0xa   :  { %427 = vmatprep.subr.bf16.mxu0 %v472_v2 }
   0xb   :  { %466 = vset.pattern.permute.xlu0 %v477_v14 }
   0xd   :  { %429 = vmatpush3.bf16.msra.mxu0 %v428_v15 }
   0xe   :  { %430 = vmatprep.subr.bf16.mxu0 %v472_v2 }
  0x11   :  { %432 = vmatpush3.bf16.msra.mxu0 %v431_v18 }
  0x12   :  { %433 = vmatprep.subr.bf16.mxu0 %v472_v2 }
  0x15   :  { %435 = vmatpush3.bf16.msra.mxu0 %v434_v21 }
  0x16   :  { %436 = vmatprep.subr.bf16.mxu0 %v472_v2 }
  0x19   :  { %438 = vmatpush3.bf16.msra.mxu0 %v437_v24 }
  0x1a   :  { %439 = vmatprep.subr.bf16.mxu0 %v472_v2 }
  0x1d   :  { %441 = vmatpush3.bf16.msra.mxu0 %v440_v27 }
  0x1e   :  { %442 = vmatprep.subr.bf16.mxu0 %v472_v2  ;;  %v479_v2 = vmov 920167782  }
  0x21   :  { %444 = vmatpush3.bf16.msra.mxu0 %v443_v30 }
  0x24   :  { %419 = vmatmul.mubr.f32.vlgmr.msra.gmra.mrb[0].mxu0 %v563_v31 }
  0x81   :  { %v22_v39 = vpop.permute.xlu0 %21 }
  0x82   :  { %v41_v41 = vpop.permute.xlu1 %40  ;;  %v28_v44 = vmul.f32 %v27_v38, %v22_v39 }
  0x83   :  { %v47_v47 = vmul.f32 %v46_v42, %v41_v41 }
  0x86   :  { %v31_v46 = vpop.permute.xlu0 %30 }
  0x87   :  { %v37_v48 = vmul.f32 %v36_v43, %v31_v46  ;;  %v51_v49 = vpop.permute.xlu1 %50 }
  0x88   :  { %v57_v51 = vmul.f32 %v56_v45, %v51_v49 }
  0x89   :  { %v38_v50 = vadd.f32 %v37_v48, %v28_v44 }
  0x8b   :  { %v48_v52 = vadd.f32 %v47_v47, %v38_v50 }
  0x8d   :  { %v569_v53 = vadd.f32 %v57_v51, %v48_v52 }
  0x8f   :  { %v62_v54 = vand.u32 2139095040, %v569_v53  ;;  %v59_v57 = vand.u32 2147483647, %v569_v53  ;;  %vm61_vm8 = vcmp.lt.s32.totalorder %v569_v53, 0  ;;  %vm151_vm0 = vweird.f32 %v569_v53 }
  0x91   :  { %v63_v55 = vshrl.u32 %v62_v54, 23  ;;  %v66_v60 = vand.u32 8388607, %v59_v57  ;;  %vm60_vm9 = vcmp.le.f32.partialorder %v59_v57, 0.7853982 }
  0x93   :  { %v361_v56 = vadd.s32 4294967169, %v63_v55  ;;  %v67_v4 = vor.u32 8388608, %v66_v60 }
  0x95   :  { %v69_v58 = vadd.s32 1, %v361_v56  ;;  %v107_v23 = vshll.u32 %v67_v4, 8 }
  0x97   :  { %vm70_vm1 = vcmp.gt.s32.totalorder %v69_v58, 0 }
  0x98   :  { %v71_v59 = vsel %vm70_vm1, %v69_v58, 0 }
  0x99   :  { %v73_v61 = vand.u32 31, %v71_v59  ;;  %v72_v62 = vshrl.u32 %v71_v59, 5 }
  0x9b   :  { %v74_v63 = vsub.s32 32, %v73_v61  ;;  %v85_v1 = vshll.u32 %v478_v0, %v73_v61  ;;  %v88_v3 = vshll.u32 %v479_v2, %v73_v61  ;;  %v76_v6 = vshll.u32 %v480_v5, %v73_v61 }
  0x9c   :  { %v79_v8 = vshll.u32 %v481_v7, %v73_v61  ;;  %v82_v10 = vshll.u32 %v482_v9, %v73_v61  ;;  %vm94_vm2 = vcmp.lt.s32.totalorder %v72_v62, 4  ;;  %vm91_vm3 = vcmp.lt.s32.totalorder %v72_v62, 1 }
  0x9d   :  { %v86_v11 = vshrl.u32 %v479_v2, %v74_v63  ;;  %v89_v13 = vshrl.u32 %v483_v12, %v74_v63  ;;  %v75_v14 = vshrl.u32 %v480_v5, %v74_v63  ;;  %v77_v15 = vshrl.u32 %v481_v7, %v74_v63 }
  0x9e   :  { %v80_v16 = vshrl.u32 %v482_v9, %v74_v63  ;;  %v83_v17 = vshrl.u32 %v478_v0, %v74_v63  ;;  %vm93_vm4 = vcmp.lt.s32.totalorder %v72_v62, 3  ;;  %vm92_vm5 = vcmp.lt.s32.totalorder %v72_v62, 2 }
  0x9f   :  { %v87_v18 = vor.u32 %v86_v11, %v85_v1  ;;  %v90_v19 = vor.u32 %v89_v13, %v88_v3  ;;  %v78_v20 = vor.u32 %v77_v15, %v76_v6 }
  0xa0   :  { %v81_v21 = vor.u32 %v80_v16, %v79_v8  ;;  %v84_v22 = vor.u32 %v83_v17, %v82_v10 }
  0xa1   :  { %v100_v24 = vsel %vm94_vm2, %v87_v18, 920167782  ;;  %v104_v25 = vsel %vm94_vm2, %v90_v19, 1326507024  ;;  %v95_v26 = vsel %vm91_vm3, %v75_v14, %v78_v20 }
  0xa2   :  { %v96_v27 = vsel %vm94_vm2, %v84_v22, 2102212464  ;;  %v99_v28 = vsel %vm91_vm3, %v78_v20, %v81_v21  ;;  %v101_v29 = vsel %vm93_vm4, %v84_v22, %v100_v24  ;;  %v103_v30 = vsel %vm91_vm3, %v81_v21, %v84_v22 }
  0xa3   :  { %v97_v32 = vsel %vm93_vm4, %v81_v21, %v96_v27  ;;  %v102_v33 = vsel %vm92_vm5, %v99_v28, %v101_v29  ;;  %v105_v34 = vsel %vm93_vm4, %v87_v18, %v104_v25 }
  0xa4   :  { %v98_v35 = vsel %vm92_vm5, %v95_v26, %v97_v32  ;;  %v106_v36 = vsel %vm92_vm5, %v103_v30, %v105_v34  ;;  %v575_v37 = vmul.u32.u64.low %v107_v23, %v102_v33  ;;  %v576_v38 = vmul.u32.u64.high %v107_v23, %v102_v33, %v575_v37 }
  0xa5   :  { %v578_v39 = vmul.u32.u64.low %v107_v23, %v106_v36  ;;  %v579_v40 = vmul.u32.u64.high %v107_v23, %v106_v36, %v578_v39  ;;  %v114_v41 = vmul.u32 %v107_v23, %v98_v35 }
  0xa6   :  { %v117_v42 = vadd.s32 1, %v576_v38 }
  0xa7   :  { %vm116_vm6 = vc.u32 %v579_v40, %v575_v37  ;;  %v115_v59 = vadd.s32 %v575_v37, %v579_v40 }
  0xa8   :  { %v118_v43 = vsel %vm116_vm6, %v117_v42, %v576_v38 }
  0xa9   :  { %v119_v44 = vadd.s32 %v118_v43, %v114_v41 }
  0xab   :  { %v120_v45 = vadd.s32 536870912, %v119_v44 }
  0xad   :  { %v121_v46 = vshrl.u32 %v120_v45, 30 }
  0xaf   :  { %v122_v47 = vshll.u32 %v121_v46, 30  ;;  %v145_v7 = vsub.s32 4, %v121_v46 }
  0xb1   :  { %v123_v48 = vsub.s32 %v119_v44, %v122_v47  ;;  %v146_v8 = vsel %vm61_vm8, %v145_v7, %v121_v46 }
  0xb2   :  { %v148_v9 = vsel %vm60_vm9, 0, %v146_v8 }
  0xb3   :  { %v125_v49 = vsub.s32 0, %v123_v48  ;;  %v255_v12 = vadd.s32 3, %v148_v9  ;;  %v152_v13 = vand.u32 3, %v148_v9 }
  0xb5   :  { %v362_v50 = vmin.u32 %v125_v49, %v123_v48  ;;  %v256_v16 = vand.u32 3, %v255_v12  ;;  %vm154_vm10 = vcmp.eq.s32.totalorder %v152_v13, 0  ;;  %vm157_vm11 = vcmp.eq.s32.totalorder %v152_v13, 2 }
  0xb6   :  { %vm153_vm14 = vcmp.lt.s32.totalorder %v152_v13, 2 }
  0xb7   :  { %v127_v51 = vclz %v362_v50  ;;  %vm258_vm12 = vcmp.eq.s32.totalorder %v256_v16, 0  ;;  %vm261_vm13 = vcmp.eq.s32.totalorder %v256_v16, 2  ;;  %vm257_vm15 = vcmp.lt.s32.totalorder %v256_v16, 2 }
  0xb9   :  { %v363_v52 = vadd.s32 4294967294, %v127_v51 }
  0xbb   :  { %vm364_vm7 = vcmp.lt.s32.totalorder %v363_v52, 0 }
  0xbc   :  { %v130_v54 = vsel %vm364_vm7, 0, %v363_v52 }
  0xbd   :  { %v135_v55 = vsub.s32 4294967266, %v130_v54  ;;  %v131_v56 = vsub.s32 32, %v130_v54  ;;  %v132_v62 = vshll.u32 %v123_v48, %v130_v54 }
  0xbf   :  { %v136_v58 = vadd.s32 127, %v135_v55  ;;  %v133_v61 = vshrl.u32 %v115_v59, %v131_v56 }
  0xc1   :  { %v137_v60 = vshll.u32 %v136_v58, 23  ;;  %v134_v0 = vor.u32 %v133_v61, %v132_v62 }
  0xc3   :  { %v138_v63 = vor.u32 4788187, %v137_v60  ;;  %v141_v2 = vcvt.s32.f32 %v134_v0 }
  0xc5   :  { %v139_v1 = vand.u32 2147483647, %v138_v63 }
  0xc7   :  { %v142_v3 = vmul.f32 %v141_v2, %v139_v1 }
  0xc9   :  { %v143_v4 = vxor.u32 2147483648, %v142_v3 }
  0xcb   :  { %v144_v5 = vsel %vm61_vm8, %v143_v4, %v142_v3 }
  0xcc   :  { %v147_v6 = vsel %vm60_vm9, %v569_v53, %v144_v5 }
  0xcd   :  { %467 = vcosq.f32 %v147_v6 }
  0xce   :  { %469 = vsinq.f32 %v147_v6 }
  0xd7   :  { %v468_v10 = vpop.eup %467 }
  0xd8   :  { %v470_v11 = vpop.eup %469  ;;  %v158_v15 = vxor.u32 2147483648, %v468_v10 }
  0xd9   :  { %v155_v14 = vxor.u32 2147483648, %v470_v11 }
  0xda   :  { %v159_v18 = vsel %vm157_vm11, %v158_v15, %v470_v11  ;;  %v263_v19 = vsel %vm261_vm13, %v158_v15, %v470_v11 }
  0xdb   :  { %v156_v17 = vsel %vm154_vm10, %v468_v10, %v155_v14  ;;  %v260_v57 = vsel %vm258_vm12, %v468_v10, %v155_v14 }
  0xdc   :  { %v160_v20 = vsel %vm153_vm14, %v156_v17, %v159_v18  ;;  %v264_v21 = vsel %vm257_vm15, %v260_v57, %v263_v19 }
  0xdd   :  { %v161_v22 = vsel %vm151_vm0, nan, %v160_v20  ;;  %v265_v23 = vsel %vm151_vm0, nan, %v264_v21 }
  0xde   :  { %v353_v25 = vmul.f32 %v563_v31, %v161_v22 }
  0xf7   :  { %v349_v24 = vpop.f32.mrb[0].mxu0 }
  0xf8   :  { %v354_v26 = vmul.f32 %v349_v24, %v265_v23  ;;  %v420_v27 = vpop.f32.mrb[1].mxu0 }
  0xfa   :  { %v355_v28 = vadd.f32 %v354_v26, %v353_v25 }
  0xfc   :  { %356 = vst [vmem:[%s598_s4] sm:$0xff] %v355_v28 }

</bundles_post_ra>
